<compile_context>
chip_gen: v6e
topology: v6e:2x2x1
jax: 0.10.0
libtpu: 0.0.40
codegen_flags: <defaults>
</compile_context>

<pallas_src>
import jax
import jax.numpy as jnp
from jax.experimental import pallas as pl
from jax.experimental.pallas import tpu as pltpu

LANE = 128          # lane width (last dim)
SUBLANE = 8         # f32 sublane width (second-to-last dim)
_MIB = 1024 * 1024
VMEM_TARGET_BYTES = 48 * _MIB   # keep working set v7x-friendly (64 MiB/TC)
VMEM_LIMIT_CAP = 64 * _MIB


def _round_up(x, m):
    return (x + m - 1) // m * m


def _make_fused_mlp_kernel(n_layers):
    """o = sigmoid(...sigmoid(x @ W0 + b0)... @ W_{L-1} + b_{L-1}).

    Args: x_ref, w0_ref, b0_ref, ..., o_ref.  Weights are bf16, biases f32.
    All intermediate activations live in vregs/VMEM (no HBM round trips).
    """
    def kernel(x_ref, *refs):
        o_ref = refs[-1]
        param_refs = refs[:-1]
        h = x_ref[...].astype(jnp.float32)
        for l in range(n_layers):                       # static unroll
            w = param_refs[2 * l][...]                  # bf16 (din_pad, dout_pad)
            b = param_refs[2 * l + 1][...]              # f32  (1, dout_pad)
            z = jnp.dot(h.astype(jnp.bfloat16), w,
                        preferred_element_type=jnp.float32) + b
            h = jax.nn.sigmoid(z)                       # f32 on the EUP
        o_ref[...] = h.astype(o_ref.dtype)
    return kernel


def mlp_forward(x, params, *, max_batch_tile=512):
    """Equivalent of MLP.forward: (Linear -> Sigmoid)* then y.view(-1).

    params: list of (W_T, b) with W_T shaped (in_features, out_features), f32.
    """
    B, Din = x.shape
    n_layers = len(params)
    dout_real = params[-1][0].shape[1]

    # --- pad every layer's feature widths to lane multiples, cast W to bf16 --
    din_pad0 = _round_up(Din, LANE)
    padded = []
    prev_pad = din_pad0
    for (w, b) in params:
        din_l, dout_l = w.shape
        dout_pad = _round_up(dout_l, LANE)
        w_p = (jnp.zeros((prev_pad, dout_pad), jnp.bfloat16)
               .at[:din_l, :dout_l].set(w.astype(jnp.bfloat16)))
        b_p = (jnp.zeros((1, dout_pad), jnp.float32)
               .at[0, :dout_l].set(b.astype(jnp.float32)))
        padded.append((w_p, b_p))
        prev_pad = dout_pad
    dout_pad_last = prev_pad

    # --- pad x: batch to sublane multiple, features to din_pad0 (zeros) ------
    B_pad = _round_up(B, SUBLANE)
    x_p = jnp.zeros((B_pad, din_pad0), jnp.float32).at[:B, :Din].set(
        x.astype(jnp.float32))

    # --- choose batch tile under an explicit VMEM budget ---------------------
    # resident params (double-buffered by the default pipeline)
    param_bytes = 2 * sum(int(w.size) * w.dtype.itemsize +
                          int(b.size) * b.dtype.itemsize for (w, b) in padded)
    widest = max([din_pad0] + [w.shape[1] for (w, _) in padded])

    def working_set(t):
        return (param_bytes
                + 2 * t * din_pad0 * 4        # x tile, double-buffered (f32)
                + 2 * t * dout_pad_last * 4   # out tile, double-buffered (f32)
                + 3 * t * widest * 4)         # live activations / headroom

    tile_b = min(_round_up(max_batch_tile, SUBLANE), B_pad)
    while tile_b > SUBLANE and working_set(tile_b) > VMEM_TARGET_BYTES:
        tile_b = max(SUBLANE, _round_up(tile_b // 2, SUBLANE))

    grid = (pl.cdiv(B_pad, tile_b),)          # no full round-up of B_pad
    rows = grid[0] * tile_b                   # rows actually computed
    vmem_limit = int(min(VMEM_LIMIT_CAP,
                         max(32 * _MIB, working_set(tile_b) + 8 * _MIB)))

    # --- flat inputs + BlockSpecs (weights/bias resident across batch grid) --
    flat_inputs = [x_p]
    in_specs = [pl.BlockSpec((tile_b, din_pad0), lambda i: (i, 0))]
    for (w_p, b_p) in padded:
        flat_inputs += [w_p, b_p]
        in_specs += [
            pl.BlockSpec(w_p.shape, lambda i: (0, 0)),   # full weight, resident
            pl.BlockSpec(b_p.shape, lambda i: (0, 0)),   # full bias, resident
        ]

    flops = 2 * rows * sum(w.shape[0] * w.shape[1] for (w, _) in padded)
    transcendentals = rows * sum(w.shape[1] for (w, _) in padded)
    bytes_accessed = (sum(int(a.size) * a.dtype.itemsize for a in flat_inputs)
                      + B_pad * dout_pad_last * 4)

    out_padded = pl.pallas_call(
        _make_fused_mlp_kernel(n_layers),
        out_shape=jax.ShapeDtypeStruct((B_pad, dout_pad_last), jnp.float32),
        grid=grid,
        in_specs=in_specs,
        out_specs=pl.BlockSpec((tile_b, dout_pad_last), lambda i: (i, 0)),
        compiler_params=pltpu.CompilerParams(
            dimension_semantics=("parallel",),
            vmem_limit_bytes=vmem_limit,
        ),
        cost_estimate=pl.CostEstimate(
            flops=int(flops),
            transcendentals=int(transcendentals),
            bytes_accessed=int(bytes_accessed),
        ),
    )(*flat_inputs)

    # drop batch padding + lane padding, then y.view(-1)
    return out_padded[:B, :dout_real].reshape(-1)


def init_mlp_params(key, layers):
    """Deterministic init matching nn.Linear shapes: W:(out,in), b:(out,).
    Stored transposed as (in, out) for the kernel."""
    params = []
    for (in_feat, out_feat) in layers:
        key, kw, kb = jax.random.split(key, 3)
        bound = 1.0 / jnp.sqrt(jnp.float32(in_feat))
        w = jax.random.uniform(kw, (out_feat, in_feat), jnp.float32, -bound, bound)
        b = jax.random.uniform(kb, (out_feat,), jnp.float32, -bound, bound)
        params.append((w.T, b))            # store transposed: (in, out)
    return params


if __name__ == "__main__":
    # XOR-style MLP: input features = 2, one hidden layer of 32, scalar output.
    layers = [(2, 32), (32, 1)]
    batch = 8

    key = jax.random.PRNGKey(0)
    key, kx = jax.random.split(key)
    x = jax.random.uniform(kx, (batch, layers[0][0]), jnp.float32)

    params = init_mlp_params(key, layers)

    out = mlp_forward(x, params)
    jax.block_until_ready(out)

    # Reference 1: same arithmetic as the kernel (bf16 matmul, f32 accum).
    ref_bf = x
    for w, b in params:
        z = jnp.dot(ref_bf.astype(jnp.bfloat16), w.astype(jnp.bfloat16),
                    preferred_element_type=jnp.float32) + b
        ref_bf = jax.nn.sigmoid(z)
    ref_bf = ref_bf.reshape(-1)

    # Reference 2: pure-f32 module semantics (loose tolerance, bf16 weights).
    ref_f32 = x
    for w, b in params:
        ref_f32 = jax.nn.sigmoid(ref_f32 @ w + b)
    ref_f32 = ref_f32.reshape(-1)

    assert out.shape == (batch,), out.shape
    assert jnp.allclose(out, ref_bf, atol=1e-4, rtol=1e-4), (out, ref_bf)
    assert jnp.allclose(out, ref_f32, atol=2e-2, rtol=2e-2), (out, ref_f32)

    print("KERNEL_OK")
</pallas_src>

<mosaic_0001>
module attributes {stable_mosaic.version = 11 : i64} {
  func.func @kernel(%arg0: i32, %arg1: memref<8x128xf32, #tpu.memory_space<vmem>>, %arg2: memref<128x128xbf16, #tpu.memory_space<vmem>>, %arg3: memref<1x128xf32, #tpu.memory_space<vmem>>, %arg4: memref<128x128xbf16, #tpu.memory_space<vmem>>, %arg5: memref<1x128xf32, #tpu.memory_space<vmem>>, %arg6: memref<8x128xf32, #tpu.memory_space<vmem>>) attributes {dimension_semantics = [#tpu.dimension_semantics<parallel>], iteration_bounds = array<i64: 1>, scalar_prefetch = 0 : i64, scratch_operands = 0 : i64, tpu.core_type = #tpu.core_type<tc>, window_params = [{transform_indices = @transform_0, window_bounds = array<i64: 8, 128>}, {pipeline_mode = #tpu.pipeline_mode<synchronous>, transform_indices = @transform_1, window_bounds = array<i64: 128, 128>}, {pipeline_mode = #tpu.pipeline_mode<synchronous>, transform_indices = @transform_2, window_bounds = array<i64: 1, 128>}, {pipeline_mode = #tpu.pipeline_mode<synchronous>, transform_indices = @transform_3, window_bounds = array<i64: 128, 128>}, {pipeline_mode = #tpu.pipeline_mode<synchronous>, transform_indices = @transform_4, window_bounds = array<i64: 1, 128>}, {transform_indices = @transform_5, window_bounds = array<i64: 8, 128>}]} {
    %c0 = arith.constant 0 : index
    %c0_0 = arith.constant 0 : index
    %0 = vector.load %arg1[%c0, %c0_0] : memref<8x128xf32, #tpu.memory_space<vmem>>, vector<8x128xf32>
    %c0_1 = arith.constant 0 : index
    %c0_2 = arith.constant 0 : index
    %1 = vector.load %arg2[%c0_1, %c0_2] : memref<128x128xbf16, #tpu.memory_space<vmem>>, vector<128x128xbf16>
    %c0_3 = arith.constant 0 : index
    %c0_4 = arith.constant 0 : index
    %2 = vector.load %arg3[%c0_3, %c0_4] : memref<1x128xf32, #tpu.memory_space<vmem>>, vector<1x128xf32>
    %3 = arith.truncf %0 : vector<8x128xf32> to vector<8x128xbf16>
    %cst = arith.constant dense<0.000000e+00> : vector<8x128xf32>
    %4 = tpu.matmul %3, %1, %cst {dimension_numbers = #tpu.dot_dimension_numbers<[1], [0], [0], [1], [0, 0, 1, 1], [], []>} : vector<8x128xbf16>, vector<128x128xbf16>, vector<8x128xf32> -> vector<8x128xf32>
    %5 = vector.broadcast %2 : vector<1x128xf32> to vector<8x128xf32>
    %6 = arith.addf %4, %5 : vector<8x128xf32>
    %7 = arith.negf %6 : vector<8x128xf32>
    %8 = math.exp %7 : vector<8x128xf32>
    %cst_5 = arith.constant 1.000000e+00 : f32
    %9 = vector.broadcast %cst_5 : f32 to vector<8x128xf32>
    %10 = arith.addf %9, %8 : vector<8x128xf32>
    %11 = arith.divf %9, %10 : vector<8x128xf32>
    %c0_6 = arith.constant 0 : index
    %c0_7 = arith.constant 0 : index
    %12 = vector.load %arg4[%c0_6, %c0_7] : memref<128x128xbf16, #tpu.memory_space<vmem>>, vector<128x128xbf16>
    %c0_8 = arith.constant 0 : index
    %c0_9 = arith.constant 0 : index
    %13 = vector.load %arg5[%c0_8, %c0_9] : memref<1x128xf32, #tpu.memory_space<vmem>>, vector<1x128xf32>
    %14 = arith.truncf %11 : vector<8x128xf32> to vector<8x128xbf16>
    %cst_10 = arith.constant dense<0.000000e+00> : vector<8x128xf32>
    %15 = tpu.matmul %14, %12, %cst_10 {dimension_numbers = #tpu.dot_dimension_numbers<[1], [0], [0], [1], [0, 0, 1, 1], [], []>} : vector<8x128xbf16>, vector<128x128xbf16>, vector<8x128xf32> -> vector<8x128xf32>
    %16 = vector.broadcast %13 : vector<1x128xf32> to vector<8x128xf32>
    %17 = arith.addf %15, %16 : vector<8x128xf32>
    %18 = arith.negf %17 : vector<8x128xf32>
    %19 = math.exp %18 : vector<8x128xf32>
    %cst_11 = arith.constant 1.000000e+00 : f32
    %20 = vector.broadcast %cst_11 : f32 to vector<8x128xf32>
    %21 = arith.addf %20, %19 : vector<8x128xf32>
    %22 = arith.divf %20, %21 : vector<8x128xf32>
    %c0_12 = arith.constant 0 : index
    %c0_13 = arith.constant 0 : index
    %23 = vector.load %arg6[%c0_12, %c0_13] : memref<8x128xf32, #tpu.memory_space<vmem>>, vector<8x128xf32>
    tpu.vector_store %arg6[%c0_12, %c0_13], %22 {strides = array<i32>} : memref<8x128xf32, #tpu.memory_space<vmem>>, vector<8x128xf32>,
    return
  }
  func.func @transform_0(%arg0: i32) -> (i32, i32) {
    %c0_i32 = arith.constant 0 : i32
    %c0_i32_0 = arith.constant 0 : i32
    return %arg0, %c0_i32 : i32, i32
  }
  func.func @transform_1(%arg0: i32) -> (i32, i32) {
    %c0_i32 = arith.constant 0 : i32
    %c0_i32_0 = arith.constant 0 : i32
    %c0_i32_1 = arith.constant 0 : i32
    return %c0_i32, %c0_i32_0 : i32, i32
  }
  func.func @transform_2(%arg0: i32) -> (i32, i32) {
    %c0_i32 = arith.constant 0 : i32
    %c0_i32_0 = arith.constant 0 : i32
    %c0_i32_1 = arith.constant 0 : i32
    return %c0_i32, %c0_i32_0 : i32, i32
  }
  func.func @transform_3(%arg0: i32) -> (i32, i32) {
    %c0_i32 = arith.constant 0 : i32
    %c0_i32_0 = arith.constant 0 : i32
    %c0_i32_1 = arith.constant 0 : i32
    return %c0_i32, %c0_i32_0 : i32, i32
  }
  func.func @transform_4(%arg0: i32) -> (i32, i32) {
    %c0_i32 = arith.constant 0 : i32
    %c0_i32_0 = arith.constant 0 : i32
    %c0_i32_1 = arith.constant 0 : i32
    return %c0_i32, %c0_i32_0 : i32, i32
  }
  func.func @transform_5(%arg0: i32) -> (i32, i32) {
    %c0_i32 = arith.constant 0 : i32
    %c0_i32_0 = arith.constant 0 : i32
    return %arg0, %c0_i32 : i32, i32
  }
}

</mosaic_0001>

<bundles_post_ra>
// kernel: tpu_custom_call.1
= control target key start
LH: loop header
LB: loop body
LE: loop exit
PB: predicated region body
PF: predicated region fallthrough
CT: control target
= control target key end

     0   :  { %10 = vsyncpa [#allocation3], 0  ;;  %s567_s0 = inlined_call_operand.hbm [shape: f32[8,128], index: 0, kind: input, shape index: {}]   ;;  %s568_s1 = inlined_call_operand.hbm [shape: bf16[128,128], index: 1, kind: input, shape index: {}]   ;;  %s569_s2 = inlined_call_operand.vmem [shape: f32[1,128], index: 2, kind: input, shape index: {}]   ;;  %s570_s3 = inlined_call_operand.hbm [shape: bf16[128,128], index: 3, kind: input, shape index: {}]   ;;  %s571_s4 = inlined_call_operand.vmem [shape: f32[1,128], index: 4, kind: input, shape index: {}]   ;;  %s572_s5 = inlined_call_operand.hbm [shape: f32[8,128], index: 5, kind: output, shape index: {}]  }
   0x1   :  { %11 = vsyncpa [#allocation6], 0 }
   0x2   :  { %12 = vsyncpa [#allocation4], 0  ;;  %s511_s18 = smov [#allocation5]  }
   0x3   :  { %s28_s19 = sshll.u32 %s511_s18, 4  ;;  %s29_s19 = int_to_ptr.vmem [resolvable:$true] %s28_s19 }
   0x4   :  { %s433_s20 = scalar_lea.vmem %s29_s19, 1024  ;;  %p438_p1 = scmp.lt.s32.totalorder %s29_s19, %s29_s19 }
   0x5   :  { %p434_p0 = scmp.ne.s32.totalorder %s29_s19, %s433_s20  ;;  %p439_p2 = scmp.lt.s32.totalorder %s433_s20, %s433_s20 }
   0x7   :  { %p440_p3 = por %p439_p2, %p438_p1 }
   0x9   :  { %p441_p4 = pnand %p440_p3, %p434_p0 }
   0xb   :  { %444 = shalt.err (!%p441_p4)
}
   0xc   :  { %s512_s21 = smov 64   ;;  %s513_s22 = smov 4  }
   0xd   :  { %34 = dma.hbm_to_vmem [thread:$0]  %s568_s1, 1024, %s29_s19, [#allocation6], %s512_s21, %s512_s21, %s513_s22  }
   0xe   :  { %s514_s25 = smov [#allocation2]   ;;  %s515_s27 = smov [#allocation7]  }
   0xf   :  { %s19_s26 = sshll.u32 %s514_s25, 4  ;;  %s42_s28 = sshll.u32 %s515_s27, 4  ;;  %s20_s26 = int_to_ptr.vmem [resolvable:$true] %s19_s26  ;;  %s43_s28 = int_to_ptr.vmem [resolvable:$true] %s42_s28 }
  0x10   :  { %s453_s29 = scalar_lea.vmem %s20_s26, 128  ;;  %p458_p6 = scmp.lt.s32.totalorder %s20_s26, %s20_s26 }
  0x11   :  { %p454_p5 = scmp.ne.s32.totalorder %s20_s26, %s453_s29  ;;  %p459_p7 = scmp.lt.s32.totalorder %s453_s29, %s453_s29 }
  0x13   :  { %p460_p8 = por %p459_p7, %p458_p6 }
  0x15   :  { %p461_p9 = pnand %p460_p8, %p454_p5 }
  0x17   :  { %464 = shalt.err (!%p461_p9)
}
  0x18   :  { %22 = dma.hbm_to_vmem [thread:$0]  %s567_s0, 128, %s20_s26, [#allocation3]  }
  0x19   :  { %s473_s7 = scalar_lea.vmem %s43_s28, 1024  ;;  %p478_p11 = scmp.lt.s32.totalorder %s43_s28, %s43_s28 }
  0x1a   :  { %p474_p10 = scmp.ne.s32.totalorder %s43_s28, %s473_s7  ;;  %p479_p12 = scmp.lt.s32.totalorder %s473_s7, %s473_s7 }
  0x1c   :  { %p480_p13 = por %p479_p12, %p478_p11 }
  0x1e   :  { %p481_p0 = pnand %p480_p13, %p474_p10 }
  0x20   :  { %484 = shalt.err (!%p481_p0)
}
  0x21   :  { %48 = dma.hbm_to_vmem [thread:$0]  %s570_s3, 1024, %s43_s28, [#allocation6], %s512_s21, %s512_s21, %s513_s22  }
  0x22   :  { %505 = dma.done.wait [#allocation3], 128  }
  0x23   :  { %506 = vsyncadd [#allocation3], 4294967168 }
  0x24   :  { %507 = dma.done.wait [#allocation6], 2048  }
  0x25   :  { %508 = vsyncadd [#allocation6], 4294965248  ;;  %v516_v0 = vmov 0.0   ;;  %vm517_vm0 = vmmov 0   ;;  %v401_v1 = vld [vmem:[#allocation5 + $0x38] sm:$0xff]   ;;  %v402_v2 = vld [vmem:[#allocation5 + $0x30] sm:$0xff]  }
  0x26   :  { %353 = vmatprep.subr.bf16.mxu0 %v516_v0  ;;  %369 = vmatprep.mubr.msk.bf16.mxu0 %vm517_vm0, %v516_v0  ;;  %v403_v3 = vld [vmem:[#allocation5 + $0x28] sm:$0xff]   ;;  %v404_v4 = vld [vmem:[#allocation5 + $0x20] sm:$0xff]   ;;  %v405_v5 = vld [vmem:[#allocation5 + $0x18] sm:$0xff]  }
  0x27   :  { %373 = vmatprep.subr.bf16.mxu1 %v516_v0  ;;  %389 = vmatprep.mubr.msk.bf16.mxu1 %vm517_vm0, %v516_v0  ;;  %v406_v6 = vld [vmem:[#allocation5 + $0x10] sm:$0xff]   ;;  %v407_v7 = vld [vmem:[#allocation5 + $0x8] sm:$0xff]   ;;  %v408_v8 = vld [vmem:[#allocation5] sm:$0xff]  }
  0x28   :  { %354 = vmatpush3.bf16.msra.mxu0 %v401_v1  ;;  %v61_v9 = vld [vmem:[#allocation2] sm:$0xff]  ;;  %v410_v12 = vld [vmem:[#allocation7 + $0x30] sm:$0xff]   ;;  %v411_v13 = vld [vmem:[#allocation7 + $0x28] sm:$0xff]  }
  0x29   :  { %355 = vmatprep.subr.bf16.mxu0 %v516_v0  ;;  %v79_v10 = vpack.c.bf16 %v61_v9, %v61_v9  ;;  %v409_v11 = vld [vmem:[#allocation7 + $0x38] sm:$0xff]   ;;  %v412_v14 = vld [vmem:[#allocation7 + $0x20] sm:$0xff]   ;;  %v414_v16 = vld [vmem:[#allocation7 + $0x10] sm:$0xff]  }
  0x2a   :  { %374 = vmatpush3.bf16.msra.mxu1 %v409_v11  ;;  %v413_v15 = vld [vmem:[#allocation7 + $0x18] sm:$0xff]   ;;  %v415_v17 = vld [vmem:[#allocation7 + $0x8] sm:$0xff]   ;;  %v416_v18 = vld [vmem:[#allocation7] sm:$0xff]  }
  0x2b   :  { %375 = vmatprep.subr.bf16.mxu1 %v516_v0  ;;  %v315_v19 = vld [vmem:[%s569_s2] ss:$0 sm:$0xff]  ;;  %s518_s2 = smov [#allocation8]  }
  0x2c   :  { %356 = vmatpush3.bf16.msra.mxu0 %v402_v2  ;;  %v325_v30 = vld [vmem:[%s571_s4] ss:$0 sm:$0xff]  ;;  %s305_s11 = sshll.u32 %s518_s2, 4  ;;  %s306_s11 = int_to_ptr.vmem [resolvable:$true] %s305_s11 }
  0x2d   :  { %357 = vmatprep.subr.bf16.mxu0 %v516_v0  ;;  %s485_s12 = scalar_lea.vmem %s306_s11, 128  ;;  %p490_p2 = scmp.lt.s32.totalorder %s306_s11, %s306_s11 }
  0x2e   :  { %376 = vmatpush3.bf16.msra.mxu1 %v410_v12  ;;  %p486_p1 = scmp.ne.s32.totalorder %s306_s11, %s485_s12  ;;  %p491_p3 = scmp.lt.s32.totalorder %s485_s12, %s485_s12 }
  0x2f   :  { %377 = vmatprep.subr.bf16.mxu1 %v516_v0 }
  0x30   :  { %358 = vmatpush3.bf16.msra.mxu0 %v403_v3  ;;  %p492_p4 = por %p491_p3, %p490_p2 }
  0x31   :  { %359 = vmatprep.subr.bf16.mxu0 %v516_v0 }
  0x32   :  { %378 = vmatpush3.bf16.msra.mxu1 %v411_v13  ;;  %p493_p5 = pnand %p492_p4, %p486_p1 }
  0x33   :  { %379 = vmatprep.subr.bf16.mxu1 %v516_v0 }
  0x34   :  { %360 = vmatpush3.bf16.msra.mxu0 %v404_v4 }
  0x35   :  { %361 = vmatprep.subr.bf16.mxu0 %v516_v0 }
  0x36   :  { %380 = vmatpush3.bf16.msra.mxu1 %v412_v14 }
  0x37   :  { %381 = vmatprep.subr.bf16.mxu1 %v516_v0 }
  0x38   :  { %362 = vmatpush3.bf16.msra.mxu0 %v405_v5 }
  0x39   :  { %363 = vmatprep.subr.bf16.mxu0 %v516_v0 }
  0x3a   :  { %382 = vmatpush3.bf16.msra.mxu1 %v413_v15 }
  0x3b   :  { %383 = vmatprep.subr.bf16.mxu1 %v516_v0 }
  0x3c   :  { %364 = vmatpush3.bf16.msra.mxu0 %v406_v6 }
  0x3d   :  { %365 = vmatprep.subr.bf16.mxu0 %v516_v0 }
  0x3e   :  { %384 = vmatpush3.bf16.msra.mxu1 %v414_v16 }
  0x3f   :  { %385 = vmatprep.subr.bf16.mxu1 %v516_v0 }
  0x40   :  { %366 = vmatpush3.bf16.msra.mxu0 %v407_v7 }
  0x41   :  { %367 = vmatprep.subr.bf16.mxu0 %v516_v0 }
  0x42   :  { %386 = vmatpush3.bf16.msra.mxu1 %v415_v17 }
  0x43   :  { %387 = vmatprep.subr.bf16.mxu1 %v516_v0 }
  0x44   :  { %368 = vmatpush3.bf16.msra.mxu0 %v408_v8 }
  0x46   :  { %388 = vmatpush3.bf16.msra.mxu1 %v416_v18 }
  0x47   :  { %370 = vmatmul.mubr.bf16.vlgmr.msra.gmra.mxu0 %v79_v10 }
 0x107   :  { %v168_v20 = vpop.f32.mrf.mxu0 }
 0x108   :  { %v169_v21 = vadd.f32 %v315_v19, %v168_v20 }
 0x109   :  { %v371_v22 = vpop.f32.mrf.mxu0 }
 0x10a   :  { %v324_v23 = vmul.f32 -1.442695, %v169_v21 }
 0x10b   :  { %v171_v24 = vpop.f32.mrf.mxu0 }
 0x10c   :  { %417 = vpow2.f32 %v324_v23 }
 0x10d   :  { %v372_v25 = vpop.f32.mrf.mxu0 }
 0x119   :  { %v418_v26 = vpop.eup %417 }
 0x11a   :  { %v177_v27 = vadd.f32 1.0, %v418_v26 }
 0x11c   :  { %419 = vrcp.f32 %v177_v27 }
 0x129   :  { %v420_v28 = vpop.eup %419 }
 0x12a   :  { %v197_v29 = vpack.c.bf16 %v420_v28, %v420_v28 }
 0x12c   :  { %390 = vmatmul.mubr.bf16.vlgmr.msra.gmra.mxu1 %v197_v29 }
 0x1ec   :  { %v286_v31 = vpop.f32.mrf.mxu1 }
 0x1ed   :  { %v287_v32 = vadd.f32 %v325_v30, %v286_v31 }
 0x1ee   :  { %v391_v33 = vpop.f32.mrf.mxu1 }
 0x1ef   :  { %v334_v34 = vmul.f32 -1.442695, %v287_v32 }
 0x1f0   :  { %v289_v35 = vpop.f32.mrf.mxu1 }
 0x1f1   :  { %421 = vpow2.f32 %v334_v34 }
 0x1f2   :  { %v392_v36 = vpop.f32.mrf.mxu1 }
 0x1fe   :  { %v422_v37 = vpop.eup %421 }
 0x1ff   :  { %v295_v38 = vadd.f32 1.0, %v422_v37 }
 0x201   :  { %423 = vrcp.f32 %v295_v38 }
 0x20e   :  { %v424_v39 = vpop.eup %423 }
 0x20f   :  { %298 = vst [vmem:[#allocation8] sm:$0xff] %v424_v39 }
 0x210   :  { %496 = shalt.err (!%p493_p5)
}
 0x211   :  { %308 = dma.vmem_to_hbm [thread:$0]  %s306_s11, 128, %s572_s5, [#allocation4]  }
 0x212   :  { %509 = dma.done.wait [#allocation4], 128  }
 0x213   :  { %510 = vsyncadd [#allocation4], 4294967168 }
 0x214   :  { %312 = vsyncpa [#allocation3], 1 }
 0x215   :  { %313 = vsyncpa [#allocation6], 1 }
 0x216   :  { %314 = vsyncpa [#allocation4], 1 }

</bundles_post_ra>
